<compile_context>
chip_gen: v7x
topology: tpu7x:2x2x1
jax: 0.10.0
libtpu: 0.0.40
codegen_flags: <defaults>
</compile_context>

<pallas_src>
import functools

import jax
import jax.numpy as jnp
from jax.experimental import pallas as pl
from jax.experimental.pallas import tpu as pltpu


# ---------------------------------------------------------------------------
# Pallas kernel.
#   x_ref   : (1, nvars, TL, D)   tile of xb in its ORIGINAL layout
#   keep_ref: (1, TL, nvars)      int8, 1 = keep, 0 = remove
#   o_ref   : (1, TL, nvars*D)    lane-dense tile of the permuted+masked output
# The permute is realized by where the (TL, D) slab of each variable lands in
# the lane-dense output row; no jnp.transpose / reshape is needed in-kernel.
# ---------------------------------------------------------------------------
def _make_mask_kernel(nvars: int, D: int):
    def kernel(x_ref, keep_ref, o_ref):
        keep = keep_ref[0]                                  # (TL, nvars) int8
        # Static unrolled loop; nvars is small for typical time-series configs.
        # TODO(synk): for very large nvars, tile nvars on the grid instead.
        for v in range(nvars):
            xv = x_ref[0, v]                                # (TL, D)
            kv = keep[:, v:v + 1] != 0                      # (TL, 1) bool
            o_ref[0, :, v * D:(v + 1) * D] = jnp.where(
                kv, xv, jnp.zeros_like(xv))                 # exact zeros
    return kernel


def random_mask_apply_pallas(xb, keep_i8, *, target_block_bytes=4 << 20):
    """xb: [bs, nvars, L, D]; keep_i8: [bs, L, nvars] (1=keep, 0=remove).

    Returns x_masked: [bs, L, nvars, D] = permute(0,2,1,3)(xb) with removed
    patches zeroed, computed in a single fused Pallas pass."""
    bs, nvars, L, D = xb.shape
    itemsize = xb.dtype.itemsize
    bytes_per_l = nvars * D * itemsize

    # L-tile: biggest multiple of 8 under the per-block VMEM byte budget.
    if L <= 8:
        tl = L
    else:
        tl = max(8, min(L, target_block_bytes // max(bytes_per_l, 1)))
        tl = (tl // 8) * 8
        # v7x: keep the grid at >=2 steps so both TensorCores get work.
        if bs * pl.cdiv(L, tl) < 2 and tl > 8:
            tl = max(8, ((tl // 2) // 8) * 8)

    grid = (bs, pl.cdiv(L, tl))

    out = pl.pallas_call(
        _make_mask_kernel(nvars, D),
        out_shape=jax.ShapeDtypeStruct((bs, L, nvars * D), xb.dtype),
        grid_spec=pltpu.PrefetchScalarGridSpec(
            num_scalar_prefetch=0,
            grid=grid,
            in_specs=[
                # Read xb in its original [bs, nvars, L, D] layout (fused permute).
                pl.BlockSpec((1, nvars, tl, D), lambda b, l: (b, 0, l, 0)),
                # Compact int8 keep factor, broadcast over D inside the kernel.
                pl.BlockSpec((1, tl, nvars), lambda b, l: (b, l, 0)),
            ],
            # Lane-dense output: last block dim is the full nvars*D extent.
            out_specs=pl.BlockSpec((1, tl, nvars * D), lambda b, l: (b, l, 0)),
        ),
        compiler_params=pltpu.CompilerParams(
            dimension_semantics=("parallel", "parallel"),
            vmem_limit_bytes=32 * 1024 * 1024,
        ),
    )(xb, keep_i8)
    # Free, contiguous trailing-dim split.
    return out.reshape(bs, L, nvars, D)


class RandomMaskingPallas:
    """JAX/Pallas equivalent of layers/Embed.py::RandomMasking."""

    def __init__(self, mask_ratio=0.15, xla_fallback_bytes=1 << 20):
        self.mask_ratio = mask_ratio
        self.xla_fallback_bytes = xla_fallback_bytes

    def __call__(self, xb, noise_key):
        # xb: [bs, nvars, L, D]  (the reference permutes it to [bs, L, nvars, D])
        bs, nvars, L, D = xb.shape
        len_keep = int(L * (1 - self.mask_ratio))

        # --- random-masking index math (plain JAX glue).
        # TODO(synk): argsort / gather-index generation has no Pallas TPU
        # equivalent; it stays in XLA (tiny: [bs, L, nvars]).
        noise = jax.random.uniform(noise_key, (bs, L, nvars), dtype=jnp.float32)
        ids_shuffle = jnp.argsort(noise, axis=1)
        ids_restore = jnp.argsort(ids_shuffle, axis=1)
        removed = ids_restore >= len_keep                       # bool [bs, L, nvars]
        mask = removed.astype(jnp.float32)                      # 1 = removed (as in ref)
        keep_i8 = jnp.logical_not(removed).astype(jnp.int8)     # 1 = keep

        # --- tiny-input cutoff: pallas_call + DMA setup would dominate.
        if xb.size * xb.dtype.itemsize < self.xla_fallback_bytes:
            xb_perm = jnp.transpose(xb, (0, 2, 1, 3))           # [bs, L, nvars, D]
            x_masked = jnp.where(removed[..., None], 0.0, xb_perm).astype(xb.dtype)
            return x_masked, mask

        # --- Pallas hot path: fused permute + zero-masking, lane-dense output.
        x_masked = random_mask_apply_pallas(xb, keep_i8)
        return x_masked, mask


if __name__ == "__main__":
    # Small shapes implied by the forward: [batch, n_vars, num_patch, patch_len].
    bs, nvars, L, D = 2, 4, 16, 16
    key = jax.random.PRNGKey(0)
    k_x, k_noise = jax.random.split(key)
    x = jax.random.normal(k_x, (bs, nvars, L, D), jnp.float32)

    # Force the Pallas path even at test-scale shapes.
    mod = RandomMaskingPallas(mask_ratio=0.15, xla_fallback_bytes=0)
    x_masked, mask = mod(x, k_noise)
    jax.block_until_ready((x_masked, mask))

    # Shape + semantics checks against a plain-JAX reference (exact zeros).
    assert x_masked.shape == (bs, L, nvars, D)
    assert mask.shape == (bs, L, nvars)
    expected = jnp.where((mask == 1.0)[..., None], 0.0,
                         jnp.transpose(x, (0, 2, 1, 3)))
    assert bool(jnp.allclose(x_masked, expected))
    len_keep = int(L * (1 - mod.mask_ratio))
    assert bool(jnp.all(jnp.sum(mask, axis=1) == float(L - len_keep)))
    print("KERNEL_OK")
</pallas_src>

<mosaic_0001>
module attributes {stable_mosaic.version = 11 : i64} {
  func.func @kernel(%arg0: i32, %arg1: i32, %arg2: memref<1x4x16x16xf32, #tpu.memory_space<vmem>>, %arg3: memref<1x16x4xi8, #tpu.memory_space<vmem>>, %arg4: memref<1x16x64xf32, #tpu.memory_space<vmem>>) attributes {dimension_semantics = [#tpu.dimension_semantics<parallel>, #tpu.dimension_semantics<parallel>], iteration_bounds = array<i64: 2, 1>, scalar_prefetch = 0 : i64, scratch_operands = 0 : i64, tpu.core_type = #tpu.core_type<tc>, window_params = [{transform_indices = @transform_0, window_bounds = array<i64: 1, 4, 16, 16>}, {transform_indices = @transform_1, window_bounds = array<i64: 1, 16, 4>}, {transform_indices = @transform_2, window_bounds = array<i64: 1, 16, 64>}]} {
    %c0 = arith.constant 0 : index
    %c0_0 = arith.constant 0 : index
    %c0_1 = arith.constant 0 : index
    %0 = vector.load %arg3[%c0, %c0_0, %c0_1] : memref<1x16x4xi8, #tpu.memory_space<vmem>>, vector<1x16x4xi8>
    %1 = vector.shape_cast %0 : vector<1x16x4xi8> to vector<16x4xi8>
    %c0_2 = arith.constant 0 : index
    %c0_3 = arith.constant 0 : index
    %c0_4 = arith.constant 0 : index
    %c0_5 = arith.constant 0 : index
    %2 = vector.load %arg2[%c0_2, %c0_3, %c0_4, %c0_5] : memref<1x4x16x16xf32, #tpu.memory_space<vmem>>, vector<1x1x16x16xf32>
    %3 = vector.shape_cast %2 : vector<1x1x16x16xf32> to vector<16x16xf32>
    %4 = vector.extract_strided_slice %1 {offsets = [0, 0], sizes = [16, 1], strides = [1, 1]} : vector<16x4xi8> to vector<16x1xi8>
    %c0_i8 = arith.constant 0 : i8
    %5 = vector.broadcast %c0_i8 : i8 to vector<16x1xi8>
    %6 = arith.cmpi ne, %4, %5 : vector<16x1xi8>
    %cst = arith.constant 0.000000e+00 : f32
    %7 = vector.broadcast %cst : f32 to vector<16x16xf32>
    %8 = vector.shape_cast %6 : vector<16x1xi1> to vector<16x1xi1>
    %9 = vector.broadcast %8 : vector<16x1xi1> to vector<16x16xi1>
    %10 = arith.select %9, %3, %7 : vector<16x16xi1>, vector<16x16xf32>
    %c0_6 = arith.constant 0 : index
    %c0_7 = arith.constant 0 : index
    %c0_8 = arith.constant 0 : index
    %11 = vector.load %arg4[%c0_6, %c0_7, %c0_8] : memref<1x16x64xf32, #tpu.memory_space<vmem>>, vector<1x16x16xf32>
    %12 = vector.shape_cast %11 : vector<1x16x16xf32> to vector<16x16xf32>
    %13 = vector.shape_cast %10 : vector<16x16xf32> to vector<1x16x16xf32>
    tpu.vector_store %arg4[%c0_6, %c0_7, %c0_8], %13 {strides = array<i32>} : memref<1x16x64xf32, #tpu.memory_space<vmem>>, vector<1x16x16xf32>,
    %c0_9 = arith.constant 0 : index
    %c1 = arith.constant 1 : index
    %c0_10 = arith.constant 0 : index
    %c0_11 = arith.constant 0 : index
    %14 = vector.load %arg2[%c0_9, %c1, %c0_10, %c0_11] : memref<1x4x16x16xf32, #tpu.memory_space<vmem>>, vector<1x1x16x16xf32>
    %15 = vector.shape_cast %14 : vector<1x1x16x16xf32> to vector<16x16xf32>
    %16 = vector.extract_strided_slice %1 {offsets = [0, 1], sizes = [16, 1], strides = [1, 1]} : vector<16x4xi8> to vector<16x1xi8>
    %c0_i8_12 = arith.constant 0 : i8
    %17 = vector.broadcast %c0_i8_12 : i8 to vector<16x1xi8>
    %18 = arith.cmpi ne, %16, %17 : vector<16x1xi8>
    %cst_13 = arith.constant 0.000000e+00 : f32
    %19 = vector.broadcast %cst_13 : f32 to vector<16x16xf32>
    %20 = vector.shape_cast %18 : vector<16x1xi1> to vector<16x1xi1>
    %21 = vector.broadcast %20 : vector<16x1xi1> to vector<16x16xi1>
    %22 = arith.select %21, %15, %19 : vector<16x16xi1>, vector<16x16xf32>
    %c0_14 = arith.constant 0 : index
    %c0_15 = arith.constant 0 : index
    %c16 = arith.constant 16 : index
    %23 = vector.load %arg4[%c0_14, %c0_15, %c16] : memref<1x16x64xf32, #tpu.memory_space<vmem>>, vector<1x16x16xf32>
    %24 = vector.shape_cast %23 : vector<1x16x16xf32> to vector<16x16xf32>
    %25 = vector.shape_cast %22 : vector<16x16xf32> to vector<1x16x16xf32>
    tpu.vector_store %arg4[%c0_14, %c0_15, %c16], %25 {strides = array<i32>} : memref<1x16x64xf32, #tpu.memory_space<vmem>>, vector<1x16x16xf32>,
    %c0_16 = arith.constant 0 : index
    %c2 = arith.constant 2 : index
    %c0_17 = arith.constant 0 : index
    %c0_18 = arith.constant 0 : index
    %26 = vector.load %arg2[%c0_16, %c2, %c0_17, %c0_18] : memref<1x4x16x16xf32, #tpu.memory_space<vmem>>, vector<1x1x16x16xf32>
    %27 = vector.shape_cast %26 : vector<1x1x16x16xf32> to vector<16x16xf32>
    %28 = vector.extract_strided_slice %1 {offsets = [0, 2], sizes = [16, 1], strides = [1, 1]} : vector<16x4xi8> to vector<16x1xi8>
    %c0_i8_19 = arith.constant 0 : i8
    %29 = vector.broadcast %c0_i8_19 : i8 to vector<16x1xi8>
    %30 = arith.cmpi ne, %28, %29 : vector<16x1xi8>
    %cst_20 = arith.constant 0.000000e+00 : f32
    %31 = vector.broadcast %cst_20 : f32 to vector<16x16xf32>
    %32 = vector.shape_cast %30 : vector<16x1xi1> to vector<16x1xi1>
    %33 = vector.broadcast %32 : vector<16x1xi1> to vector<16x16xi1>
    %34 = arith.select %33, %27, %31 : vector<16x16xi1>, vector<16x16xf32>
    %c0_21 = arith.constant 0 : index
    %c0_22 = arith.constant 0 : index
    %c32 = arith.constant 32 : index
    %35 = vector.load %arg4[%c0_21, %c0_22, %c32] : memref<1x16x64xf32, #tpu.memory_space<vmem>>, vector<1x16x16xf32>
    %36 = vector.shape_cast %35 : vector<1x16x16xf32> to vector<16x16xf32>
    %37 = vector.shape_cast %34 : vector<16x16xf32> to vector<1x16x16xf32>
    tpu.vector_store %arg4[%c0_21, %c0_22, %c32], %37 {strides = array<i32>} : memref<1x16x64xf32, #tpu.memory_space<vmem>>, vector<1x16x16xf32>,
    %c0_23 = arith.constant 0 : index
    %c3 = arith.constant 3 : index
    %c0_24 = arith.constant 0 : index
    %c0_25 = arith.constant 0 : index
    %38 = vector.load %arg2[%c0_23, %c3, %c0_24, %c0_25] : memref<1x4x16x16xf32, #tpu.memory_space<vmem>>, vector<1x1x16x16xf32>
    %39 = vector.shape_cast %38 : vector<1x1x16x16xf32> to vector<16x16xf32>
    %40 = vector.extract_strided_slice %1 {offsets = [0, 3], sizes = [16, 1], strides = [1, 1]} : vector<16x4xi8> to vector<16x1xi8>
    %c0_i8_26 = arith.constant 0 : i8
    %41 = vector.broadcast %c0_i8_26 : i8 to vector<16x1xi8>
    %42 = arith.cmpi ne, %40, %41 : vector<16x1xi8>
    %cst_27 = arith.constant 0.000000e+00 : f32
    %43 = vector.broadcast %cst_27 : f32 to vector<16x16xf32>
    %44 = vector.shape_cast %42 : vector<16x1xi1> to vector<16x1xi1>
    %45 = vector.broadcast %44 : vector<16x1xi1> to vector<16x16xi1>
    %46 = arith.select %45, %39, %43 : vector<16x16xi1>, vector<16x16xf32>
    %c0_28 = arith.constant 0 : index
    %c0_29 = arith.constant 0 : index
    %c48 = arith.constant 48 : index
    %47 = vector.load %arg4[%c0_28, %c0_29, %c48] : memref<1x16x64xf32, #tpu.memory_space<vmem>>, vector<1x16x16xf32>
    %48 = vector.shape_cast %47 : vector<1x16x16xf32> to vector<16x16xf32>
    %49 = vector.shape_cast %46 : vector<16x16xf32> to vector<1x16x16xf32>
    tpu.vector_store %arg4[%c0_28, %c0_29, %c48], %49 {strides = array<i32>} : memref<1x16x64xf32, #tpu.memory_space<vmem>>, vector<1x16x16xf32>,
    return
  }
  func.func @transform_0(%arg0: i32, %arg1: i32) -> (i32, i32, i32, i32) {
    %c0_i32 = arith.constant 0 : i32
    %c0_i32_0 = arith.constant 0 : i32
    %c0_i32_1 = arith.constant 0 : i32
    return %arg0, %c0_i32, %arg1, %c0_i32_0 : i32, i32, i32, i32
  }
  func.func @transform_1(%arg0: i32, %arg1: i32) -> (i32, i32, i32) {
    %c0_i32 = arith.constant 0 : i32
    %c0_i32_0 = arith.constant 0 : i32
    return %arg0, %arg1, %c0_i32 : i32, i32, i32
  }
  func.func @transform_2(%arg0: i32, %arg1: i32) -> (i32, i32, i32) {
    %c0_i32 = arith.constant 0 : i32
    %c0_i32_0 = arith.constant 0 : i32
    return %arg0, %arg1, %c0_i32 : i32, i32, i32
  }
}

</mosaic_0001>

<bundles_post_ra>
// kernel: tpu_custom_call.1
= control target key start
LH: loop header
LB: loop body
LE: loop exit
PB: predicated region body
PF: predicated region fallthrough
CT: control target
= control target key end

     0   :  { %7 = vsyncpa [#allocation3], 0  ;;  %s900_s0 = inlined_call_operand.hbm [shape: f32[2,4,16,16], index: 0, kind: input, shape index: {}]   ;;  %s901_s1 = inlined_call_operand.vmem [shape: s8[2,16,4], index: 1, kind: input, shape index: {}]   ;;  %s902_s2 = inlined_call_operand.hbm [shape: f32[2,16,64], index: 2, kind: output, shape index: {}]  }
   0x1   :  { %9 = vsyncpa [#allocation3 + $0x1], 0 }
   0x2   :  { %10 = vsyncpa [#allocation4], 0 }
   0x3   :  { %12 = vsyncpa [#allocation4 + $0x1], 0  ;;  %s707_s9 = smov 0   ;;  %s709_s10 = smov 0  }
   0x4   :  { %s711_s11 = smov 0   ;;  %s713_s12 = smov 0  }
   0x5   :  { %s715_s13 = smov 0   ;;  %s717_s14 = smov 0  }
   0x6 LB: > { %s464_s15 = sadd.s32 4294967295, %s677_s14   ;;  %s465_s16 = sadd.s32 4294967294, %s677_s14   ;;  %s677_s14 = sphi %s717_s14, %s18_s14   ;;  %s673_s13 = sphi %s715_s13, %s917_s13   ;;  %s669_s12 = sphi %s713_s12, %s916_s12   ;;  %s665_s11 = sphi %s711_s11, %s915_s11   ;;  %s661_s10 = sphi %s709_s10, %s914_s10   ;;  %s657_s9 = sphi %s707_s9, %s913_s9  }
   0x7   : > { %s30_s17 = sadd.s32 1, %s673_s13  ;;  %s39_s18 = sadd.s32 1, %s665_s11 }
   0x8   : > { %p32_p0 = scmp.ge.s32.totalorder %s30_s17, 2  ;;  %p46_p1 = scmp.ne.s32.totalorder %s665_s11, %s661_s10 }
   0x9   : > { %p47_p2 = scmp.eq.s32.totalorder %s677_s14, 0  ;;  %p52_p3 = scmp.ne.s32.totalorder %s661_s10, %s657_s9 }
   0xa   : > { %s919_s17 = smov (%p32_p0, %s30_s17), 0  ;;  %p53_p5 = scmp.eq.s32.totalorder %s464_s15, 0 }
   0xb   : > { %p748_p4 = por %p47_p2, %p46_p1  ;;  %s34_s20 = ssub.s32 %s673_s13, %s919_s17 }
   0xc   : > { %p106_p6 = scmp.eq.s32.totalorder %s464_s15, 1  ;;  %p37_p7 = scmp.eq.s32.totalorder %s34_s20, 0 }
   0xd   : > { %p754_p8 = por %p53_p5, %p52_p3  ;;  %p112_p10 = scmp.eq.s32.totalorder %s465_s16, 1 }
   0xe   : > { %p758_p9 = por %p106_p6, %p46_p1  ;;  %p502_p13 = scmp.lt.s32.totalorder %s677_s14, 2 }
   0xf   : > { %s763_s23 = scalar_select %p37_p7, %s665_s11, %s39_s18  }
  0x10   : > { %s906_s22 = scalar_select %p758_p9, 1, 0 }
  0x11   : > { %p765_p11 = por %p112_p10, %p52_p3  ;;  %s132_s25 = sand.u32 1, %s665_s11  }
  0x12   : > { %s468_s26 = sshll.u32 %s132_s25, 6  ;;  %s487_s27 = sshll.u32 %s673_s13, 10 }
  0x13   : > { %s907_s24 = scalar_select %p765_p11, 1, 0 }
  0x14   : > { %s776_s30 = scalar_lea.hbm %s900_s0, %s487_s27  ;;  %s136_s3 = scalar_lea.vmem [#allocation2], %s468_s26 }
  0x15   : > { %s145_s4 = sshll.u32 %s136_s3, 4  ;;  %p782_p0 = pnand %p502_p13, %p748_p4  ;;  %s778_s4 = int_to_ptr.vmem [resolvable:$true] %s145_s4 }
  0x16   : > { %s787_s6 = scalar_lea.sflag [#allocation3], %s132_s25  ;;  %s565_s7 = scalar_lea.hbm %s776_s30, 1024 }
  0x17   : > { %p566_p2 = scmp.ne.s32.totalorder %s776_s30, %s565_s7  ;;  %p567_p3 = pneg %p782_p0 }
  0x18   : > { %s570_s16 = scalar_lea.hbm %s900_s0, 2048  ;;  %p571_p4 = scmp.lt.u32.totalorder %s776_s30, %s900_s0 }
  0x19   : > { %p568_p5 = pnand %p567_p3, %p566_p2  ;;  %p572_p7 = scmp.lt.u32.totalorder %s570_s16, %s565_s7 }
  0x1a   : > { %p574_p13 = scmp.lt.u32.totalorder %s565_s7, %s776_s30 }
  0x1b   : > { %p569_p6 = pneg %p568_p5  ;;  %p573_p10 = por %p572_p7, %p571_p4 }
  0x1d   : > { %p575_p12 = por %p574_p13, %p573_p10 }
  0x1f   : > { %p576_p1 = pnand %p575_p12, %p569_p6 }
  0x21   : > { %579 = shalt.err (!%p576_p1)
}
  0x22   : > { %s580_s20 = scalar_lea.vmem %s778_s4, 1024  ;;  %s679_s25 = smov [#allocation2]  }
  0x23   : > { %p581_p2 = scmp.ne.s32.totalorder %s778_s4, %s580_s20  ;;  %s585_s26 = sshll.u32 %s679_s25, 4  ;;  %s586_s26 = int_to_ptr.vmem [resolvable:$false] %s585_s26 }
  0x24   : > { %s587_s27 = scalar_lea.vmem %s586_s26, 2048  ;;  %p588_p9 = scmp.lt.s32.totalorder %s778_s4, %s586_s26 }
  0x25   : > { %p583_p5 = pnand %p581_p2, %p567_p3  ;;  %p589_p4 = scmp.lt.s32.totalorder %s587_s27, %s580_s20 }
  0x27   : > { %p584_p11 = pneg %p583_p5  ;;  %p590_p7 = por %p589_p4, %p588_p9 }
  0x29   : > { %p591_p10 = pnand %p590_p7, %p584_p11 }
  0x2b   : > { %594 = shalt.err (!%p591_p10)
}
  0x2c   : > { %s680_s28 = smov 128   ;;  %s681_s29 = smov 8  }
  0x2d   : > { %497 = dma.hbm_to_vmem [thread:$0]  (!%p782_p0), %s776_s30, 1024, %s778_s4, %s787_s6, %s680_s28, %s680_s28, %s681_s29  }
  0x2e   : > { %p166_p12 = scmp.lt.s32.totalorder %s677_s14, 3  ;;  %p909_p1 = scmp.ge.s32.totalorder %s677_s14, 1 }
  0x30   : > { %p167_p3 = pnand %p909_p1, %p166_p12 }
  0x31   : > { %s819_s3 = sand.u32 (!%p167_p3), 1, %s661_s10  }
  0x32   : > { %170 = sbr.rel (%p167_p3) target bundleno = 460 (0x1cc), region = 28  ;;  %s472_s7 = sshll.u32 (!%p167_p3), %s819_s3, 6 }
  0x33   : > { %s173_s8 = scalar_lea.sflag (!%p167_p3), [#allocation3], %s819_s3  ;;  %s823_s15 = scalar_lea.vmem (!%p167_p3), [#allocation2], %s472_s7 }
  0x39   : > { %648 = dma.done.wait (%p754_p8), %s173_s8, 1024  }
  0x3a   : > { %650 = vsyncadd (%p754_p8), %s173_s8, 4294966272  ;;  %p208_p9 = scmp.lt.s32.totalorder %s669_s12, 1  ;;  %v682_v0 = vmov 0   ;;  %s683_s21 = smov 126   ;;  %v476_v21 = vld [vmem:[%s823_s15 + $0x10] sm:$0xff]  ;;  %v477_v24 = vld [vmem:[%s823_s15 + $0x18] sm:$0xff] }
  0x3b   : > { %563 = vset.pattern.permute.xlu0 %v682_v0  ;;  %564 = vset.pattern.permute.xlu1 %v682_v0  ;;  %s684_s18 = smov 127   ;;  %s685_s19 = smov 125   ;;  %v479_v28 = vld [vmem:[%s823_s15 + $0x28] sm:$0xff]  ;;  %v478_v29 = vld [vmem:[%s823_s15 + $0x20] sm:$0xff]  ;;  %v481_v34 = vld [vmem:[%s823_s15 + $0x38] sm:$0xff]  ;;  %vm244_vm15 = vcmask 130048  }
  0x3c   : > { %s209_s30 = scalar_select %p208_p9, %s669_s12, 1  ;;  %v480_v35 = vld [vmem:[%s823_s15 + $0x30] sm:$0xff]  ;;  %v223_v36 = vld [vmem:[%s823_s15 + $0x8] sm:$0xff]  ;;  %v222_v42 = vld [vmem:[%s823_s15] sm:$0xff] }
  0x3d   : > { %s686_s20 = smov 16   ;;  %s473_s25 = sshll.u32 %s819_s3, 4 }
  0x3e   : > { %s488_s4 = sshll.u32 %s209_s30, 2  ;;  %s687_s26 = smov 32  }
  0x3f   : > { %s215_s16 = scalar_lea.vmem %s901_s1, %s488_s4  ;;  %s205_s27 = scalar_lea.vmem [#allocation5], %s473_s25 }
  0x40   : > { %v220_v1 = vld [vmem:[%s215_s16] sm:$0x3]  ;;  %v221_v2 = vld [vmem:[%s215_s16 + $0x2] sm:$0x3]  ;;  %s688_s28 = smov 48   ;;  %s489_s29 = sshll.u32 %s669_s12, 8 }
  0x41   : > { %vm224_vm0 = vnez %v220_v1  ;;  %vm225_vm1 = vnez %v221_v2  ;;  %s359_s7 = sshll.u32 %s205_s27, 4  ;;  %s849_s30 = scalar_lea.hbm %s902_s2, %s489_s29  ;;  %s851_s7 = int_to_ptr.vmem [resolvable:$true] %s359_s7 }
  0x42   : > { %v226_v3 = vsel %vm224_vm0, 16843009, %v682_v0  ;;  %v227_v4 = vsel %vm225_vm1, 16843009, %v682_v0  ;;  %s344_s12 = scalar_lea.sflag [#allocation4], %s819_s3  ;;  %s595_s4 = scalar_lea.vmem %s851_s7, 256 }
  0x43   : > { %v228_v5 = vunpack.c.0.s8 %v226_v3  ;;  %v229_v6 = vunpack.c.0.s8 %v227_v4  ;;  %p596_p8 = scmp.ne.s32.totalorder %s851_s7, %s595_s4  ;;  %p910_p11 = scmp.ne.s32.totalorder %s906_s22, 0 }
  0x44   : > { %s689_s5 = smov [#allocation5]  }
  0x45   : > { %vm230_vm2 = vcmp.ne.s32.totalorder %v228_v5, 0  ;;  %vm231_vm3 = vcmp.ne.s32.totalorder %v229_v6, 0  ;;  %p597_p0 = pnand %p596_p8, %p910_p11  ;;  %s599_s6 = sshll.u32 %s689_s5, 4  ;;  %s600_s6 = int_to_ptr.vmem [resolvable:$false] %s599_s6 }
  0x46   : > { %v232_v7 = vsel %vm230_vm2, 1, %v682_v0  ;;  %v233_v8 = vsel %vm231_vm3, 1, %v682_v0  ;;  %vm276_vm3 = vcmask 261248   ;;  %s601_s16 = scalar_lea.vmem %s600_s6, 512  ;;  %p602_p13 = scmp.lt.s32.totalorder %s851_s7, %s600_s6 }
  0x47   : > { %282 = vrot.lane.b32.xlu1 %v232_v7, %s683_s21  ;;  %250 = vrot.lane.b32.xlu0 %v232_v7, %s684_s18  ;;  %p598_p6 = pneg %p597_p0  ;;  %p603_p2 = scmp.lt.s32.totalorder %s601_s16, %s595_s4 }
  0x49   : > { %p604_p5 = por %p603_p2, %p602_p13 }
  0x4b   : > { %284 = vrot.lane.b32.xlu1 %v233_v8, %s683_s21  ;;  %252 = vrot.lane.b32.xlu0 %v233_v8, %s684_s18  ;;  %p605_p4 = pnand %p604_p5, %p598_p6 }
  0x4f   : > { %316 = vrot.lane.b32.xlu1 %v233_v8, %s685_s19  ;;  %314 = vrot.lane.b32.xlu0 %v232_v7, %s685_s19 }
  0xb9   : > { %v283_v9 = vpop.permute.xlu1 %282  ;;  %v251_v10 = vpop.permute.xlu0 %250 }
  0xba   : > { %vm254_vm4 = vcmp.ne.s32.totalorder %v251_v10, 0  ;;  %vm286_vm7 = vcmp.ne.s32.totalorder %v283_v9, 0 }
  0xbb   : > { %v256_v11 = vsel %vm254_vm4, 1, %v682_v0  ;;  %v288_v18 = vsel %vm286_vm7, 1, %v682_v0  ;;  %vm308_vm4 = vcmask 392448  }
  0xbc   : > { %259 = vperm.xlu0 %563, %v256_v11  }
  0xbd   : > { %v285_v12 = vpop.permute.xlu1 %284  ;;  %v253_v13 = vpop.permute.xlu0 %252 }
  0xbe   : > { %vm287_vm5 = vcmp.ne.s32.totalorder %v285_v12, 0  ;;  %vm255_vm6 = vcmp.ne.s32.totalorder %v253_v13, 0 }
  0xbf   : > { %v289_v14 = vsel %vm287_vm5, 1, %v682_v0  ;;  %v257_v15 = vsel %vm255_vm6, 1, %v682_v0  ;;  %vm340_vm5 = vcmask 523648  }
  0xc0   : > { %294 = vperm.xlu0 %563, %v289_v14   ;;  %262 = vperm.xlu1 %564, %v257_v15  }
  0xc1   : > { %v317_v16 = vpop.permute.xlu1 %316  ;;  %v315_v17 = vpop.permute.xlu0 %314 }
  0xc2   : > { %vm319_vm8 = vcmp.ne.s32.totalorder %v317_v16, 0  ;;  %vm318_vm9 = vcmp.ne.s32.totalorder %v315_v17, 0 }
  0xc3   : > { %v321_v19 = vsel %vm319_vm8, 1, %v682_v0  ;;  %v320_v20 = vsel %vm318_vm9, 1, %v682_v0 }
  0xc4   : > { %326 = vperm.xlu0 %563, %v321_v19   ;;  %291 = vperm.xlu1 %564, %v288_v18  }
  0xc8   : > { %238 = vperm.xlu0 %563, %v233_v8   ;;  %323 = vperm.xlu1 %564, %v320_v20  }
  0xcc   : > { %235 = vperm.xlu1 %564, %v232_v7  }
 0x13b   : > { %v260_v22 = vpop.permute.xlu0 %259 }
 0x13c   : > { %vm264_vm10 = vcmp.eq.s32.totalorder %v260_v22, 1 }
 0x13d   : > { %v266_v23 = vsel %vm264_vm10, %v476_v21, 0.0 }
 0x13e   : > { %270 = vrot.lane.b32.xlu1 %v266_v23, %s686_s20 }
 0x13f   : > { %v263_v25 = vpop.permute.xlu1 %262  ;;  %v295_v26 = vpop.permute.xlu0 %294 }
 0x140   : > { %vm265_vm11 = vcmp.eq.s32.totalorder %v263_v25, 1  ;;  %vm297_vm12 = vcmp.eq.s32.totalorder %v295_v26, 1 }
 0x141   : > { %v267_v27 = vsel %vm265_vm11, %v477_v24, 0.0  ;;  %v299_v32 = vsel %vm297_vm12, %v479_v28, 0.0 }
 0x142   : > { %272 = vrot.lane.b32.xlu0 %v267_v27, %s686_s20 }
 0x143   : > { %v292_v30 = vpop.permute.xlu1 %291  ;;  %v327_v31 = vpop.permute.xlu0 %326 }
 0x144   : > { %vm296_vm13 = vcmp.eq.s32.totalorder %v292_v30, 1  ;;  %vm329_vm14 = vcmp.eq.s32.totalorder %v327_v31, 1 }
 0x145   : > { %v298_v33 = vsel %vm296_vm13, %v478_v29, 0.0  ;;  %v331_v39 = vsel %vm329_vm14, %v481_v34, 0.0 }
 0x146   : > { %302 = vrot.lane.b32.xlu1 %v298_v33, %s687_s26  ;;  %304 = vrot.lane.b32.xlu0 %v299_v32, %s687_s26 }
 0x147   : > { %v324_v37 = vpop.permute.xlu1 %323  ;;  %v239_v38 = vpop.permute.xlu0 %238 }
 0x148   : > { %vm328_vm0 = vcmp.eq.s32.totalorder %v324_v37, 1  ;;  %vm241_vm1 = vcmp.eq.s32.totalorder %v239_v38, 1 }
 0x149   : > { %v330_v40 = vsel %vm328_vm0, %v480_v35, 0.0  ;;  %v243_v41 = vsel %vm241_vm1, %v223_v36, 0.0 }
 0x14a   : > { %246 = vst.msk [vmem:[%s205_s27 + $0x8] sm:$0xff] %vm244_vm15, %v243_v41  ;;  %334 = vrot.lane.b32.xlu1 %v330_v40, %s688_s28  ;;  %336 = vrot.lane.b32.xlu0 %v331_v39, %s688_s28 }
 0x14b   : > { %v236_v43 = vpop.permute.xlu1 %235 }
 0x14c   : > { %vm240_vm2 = vcmp.eq.s32.totalorder %v236_v43, 1 }
 0x14d   : > { %v242_v44 = vsel %vm240_vm2, %v222_v42, 0.0 }
 0x14e   : > { %245 = vst.msk [vmem:[%s205_s27] sm:$0xff] %vm244_vm15, %v242_v44 }
 0x1b0   : > { %v271_v45 = vpop.permute.xlu1 %270 }
 0x1b1   : > { %277 = vst.msk [vmem:[%s205_s27] sm:$0xff] %vm276_vm3, %v271_v45 }
 0x1b4   : > { %v273_v46 = vpop.permute.xlu0 %272 }
 0x1b5   : > { %278 = vst.msk [vmem:[%s205_s27 + $0x8] sm:$0xff] %vm276_vm3, %v273_v46 }
 0x1b8   : > { %v303_v47 = vpop.permute.xlu1 %302  ;;  %v305_v48 = vpop.permute.xlu0 %304 }
 0x1b9   : > { %309 = vst.msk [vmem:[%s205_s27] sm:$0xff] %vm308_vm4, %v303_v47  ;;  %310 = vst.msk [vmem:[%s205_s27 + $0x8] sm:$0xff] %vm308_vm4, %v305_v48 }
 0x1bc   : > { %v335_v49 = vpop.permute.xlu1 %334  ;;  %v337_v50 = vpop.permute.xlu0 %336 }
 0x1bd   : > { %341 = vst.msk [vmem:[%s205_s27] sm:$0xff] %vm340_vm5, %v335_v49  ;;  %342 = vst.msk [vmem:[%s205_s27 + $0x8] sm:$0xff] %vm340_vm5, %v337_v50 }
 0x1be   : > { %608 = shalt.err (!%p605_p4)
}
 0x1bf   : > { %s609_s21 = scalar_lea.hbm %s849_s30, 256  ;;  %s613_s20 = scalar_lea.hbm %s902_s2, 512 }
 0x1c0   : > { %p610_p7 = scmp.ne.s32.totalorder %s849_s30, %s609_s21  ;;  %p614_p1 = scmp.lt.u32.totalorder %s849_s30, %s902_s2 }
 0x1c1   : > { %p615_p3 = scmp.lt.u32.totalorder %s613_s20, %s609_s21  ;;  %p617_p8 = scmp.lt.u32.totalorder %s609_s21, %s849_s30 }
 0x1c2   : > { %p611_p10 = pnand %p610_p7, %p910_p11 }
 0x1c3   : > { %p616_p9 = por %p615_p3, %p614_p1 }
 0x1c4   : > { %p612_p12 = pneg %p611_p10 }
 0x1c5   : > { %p618_p0 = por %p617_p8, %p616_p9 }
 0x1c7   : > { %p619_p6 = pnand %p618_p0, %p612_p12 }
 0x1c9   : > { %622 = shalt.err (!%p619_p6)
}
 0x1ca   : > { %s690_s27 = smov 128   ;;  %s691_s28 = smov 8  }
 0x1cb   : > { %492 = dma.vmem_to_hbm [thread:$0]  (%p910_p11), %s851_s7, 256, %s849_s30, %s344_s12, %s690_s27, %s690_s27, %s691_s28  }
 0x1cc PF: > { %s374_s29 = sand.u32 1, %s657_s9   ;;  %p911_p13 = scmp.ne.s32.totalorder %s907_s24, 0 }
 0x1cd   : > { %p912_p2 = scmp.ge.s32.totalorder %s677_s14, 2  ;;  %s375_s8 = scalar_lea.sflag [#allocation4], %s374_s29 }
 0x1cf   : > { %p499_p5 = pnand %p912_p2, %p911_p13 }
 0x1d1   : > { %652 = dma.done.wait (!%p499_p5), %s375_s8, 256  }
 0x1d2   : > { %654 = vsyncadd (!%p499_p5), %s375_s8, 4294967040  ;;  %s18_s14 = sadd.s32 1, %s677_s14   ;;  %s913_s9 = smov %s661_s10 }
 0x1d3   : > { %p15_p4 = scmp.ge.s32.totalorder %s18_s14, 4   ;;  %s914_s10 = smov %s665_s11 }
 0x1d4   : > { %s915_s11 = smov %s763_s23  ;;  %s916_s12 = smov %s673_s13 }
 0x1d5   : > { %s917_s13 = smov %s919_s17  ;;  %17 = sbr.rel (!%p15_p4) target bundleno = 6 (0x6), region = 79 }
 0x1dc   :  { %380 = vsyncpa [#allocation3], 1 }
 0x1dd   :  { %382 = vsyncpa [#allocation3 + $0x1], 1 }
 0x1de   :  { %383 = vsyncpa [#allocation4], 1 }
 0x1df   :  { %385 = vsyncpa [#allocation4 + $0x1], 1 }

</bundles_post_ra>
